<compile_context>
chip_gen: v5e
topology: v5e:2x2
jax: 0.10.0
libtpu: 0.0.40
codegen_flags: <defaults>
</compile_context>

<pallas_src>
import functools

import numpy as np
import jax
import jax.numpy as jnp
from jax.experimental import pallas as pl
from jax.experimental.pallas import tpu as pltpu


# ----------------------------------------------------------------------------
# Pallas kernel
# ----------------------------------------------------------------------------
def _boundary_kernel(pf_ref, pb_ref, slop_ref, amp_ref,
                     dist_ref, stats_ref, *,
                     function_length, distribution_length, slope_is_zero):
    # pf_ref / pb_ref : (L, Nt)  per-sample fg / bg probabilities (segments)
    # slop_ref/amp_ref: (1, Nt)  per-line slope / amplitude
    # dist_ref        : (D, Nt)  normalised statistical distribution
    # stats_ref       : (2, Nt)  row 0 = distribution mean, row 1 = 1/variance
    F = function_length
    D = distribution_length

    pf = pf_ref[...]
    pb = pb_ref[...]
    slop = slop_ref[...]            # (1, Nt)
    amp = amp_ref[...]              # (1, Nt)

    # --- lookup rows: x[f] = f - (F-1)/2 is symmetric about 0 and tanh is odd,
    # so only ceil(F/2) tanh rows are evaluated (EUP) and mirrored.
    lf_rows = [None] * F
    if not slope_is_zero:
        inv_2slop = 1.0 / (2.0 * slop)          # exact divide, one (1,Nt) row
    for f in range(F // 2):
        xf = float(f) - (F - 1) / 2.0           # strictly negative
        if slope_is_zero:
            # sign(xf) = -1, sign(-xf) = +1
            lf_rows[f] = 0.5 + amp
            lf_rows[F - 1 - f] = 0.5 - amp
        else:
            t = jnp.tanh(xf * inv_2slop)        # (1, Nt) -> EUP
            lf_rows[f] = 0.5 - amp * t
            lf_rows[F - 1 - f] = 0.5 + amp * t
    if F % 2 == 1:
        lf_rows[F // 2] = jnp.full_like(amp, 0.5)   # x == 0: tanh(0)=sign(0)=0

    # --- sliding-window correlation as F accumulation steps over a (D, Nt)
    # buffer.  Pure VALU multiply/adds; no per-window sublane reductions and no
    # concat.  stat[d] = prod_f (pf[d+f]*lf[f] + pb[d+f]*(1-lf[f]))
    #                  = prod_f (pb[d+f] + lf[f]*(pf[d+f]-pb[d+f]))
    diff = pf - pb                                  # (L, Nt)
    use_log = F > 20   # guard f32 underflow of the raw product for very long F
    acc = None
    for f in range(F):
        term = pb[f:f + D, :] + lf_rows[f] * diff[f:f + D, :]     # (D, Nt)
        if use_log:
            term = jnp.log(term)
            acc = term if acc is None else acc + term
        else:
            acc = term if acc is None else acc * term
    stat = jnp.exp(acc) if use_log else acc                        # (D, Nt)

    # torch.nn.functional.normalize(p=1, dim=-1): stat >= 0 by construction so
    # no abs; exact reciprocal (feeds user-visible outputs downstream).
    denom = jnp.maximum(jnp.sum(stat, axis=0, keepdims=True), 1e-12)
    dist = stat * (1.0 / denom)
    dist_ref[...] = dist

    # TODO(synk): line_distribution_extractor is an injected nn.Module of
    # unknown architecture; identity pass-through assumed here (a non-identity
    # extractor would have to run between this point and the Gaussian fit).

    # fit_gaussian_distribution
    step = (jax.lax.broadcasted_iota(jnp.int32, (D, 1), 0)
            .astype(jnp.float32))                                  # (D, 1)
    tmp_mean = jnp.sum(step * dist, axis=0, keepdims=True)         # (1, Nt)
    tmp_var = jnp.sum((step - tmp_mean) ** 2 * dist,
                      axis=0, keepdims=True)                       # (1, Nt)
    mean = tmp_mean - (D - 1) / 2.0

    # min variance: laplace bound from amplitude vs gaussian bound from slope
    ratio = (1.0 + 2.0 * amp) / (1.0 - 2.0 * amp)
    min_var_laplace = 2.0 / (jnp.log(ratio) ** 2)
    min_var = jnp.maximum(min_var_laplace, slop)
    variance = jnp.maximum(tmp_var, min_var)
    inv_var = 1.0 / variance                                       # exact

    stats_ref[0:1, :] = mean
    stats_ref[1:2, :] = inv_var


# ----------------------------------------------------------------------------
# Wrapper: layout, padding, tiling
# ----------------------------------------------------------------------------
def _pick_tile_n(m):
    # Largest lane tile in {1024,512,256,128} that divides m, preferring one
    # that leaves >= 2 grid steps (so both v7x TensorCores get work).  The
    # per-tile working set at 1024 lanes is ~0.3 MiB — comfortably within
    # v5e/v6e/v7x VMEM and vreg budgets; 1024 is the cap suggested for v5e.
    for t in (1024, 512, 256, 128):
        if m % t == 0 and m // t >= 2:
            return t
    for t in (1024, 512, 256, 128):
        if m % t == 0:
            return t
    return 128


def boundary_distribution_pallas(pf_segments, pb_segments, lines_slop,
                                 lines_amplitude, *, function_slope,
                                 function_length, distribution_length):
    """pf/pb_segments [B,N,L], lines_slop/amplitude [B,N]  ->
       (distributions [B,N,D], mean [B,N], 1/variance [B,N])."""
    b, n, l = pf_segments.shape
    fl = function_length
    dl = distribution_length
    assert l >= fl + dl - 1, "segments too short for the sliding window"

    # Flatten (B, N) onto one lane axis, pad to a multiple of 128 lanes.
    m_raw = b * n
    m = max(128, ((m_raw + 127) // 128) * 128)
    pad = m - m_raw

    # TODO(synk): if the producer can emit pf/pb already in (L, B*N) layout,
    # these transposes (one extra HBM pass each) disappear entirely.
    pf_t = (jnp.transpose(pf_segments, (2, 0, 1))
            .reshape(l, m_raw).astype(jnp.float32))               # (L, B*N)
    pb_t = (jnp.transpose(pb_segments, (2, 0, 1))
            .reshape(l, m_raw).astype(jnp.float32))
    slop = lines_slop.reshape(1, m_raw).astype(jnp.float32)
    amp = lines_amplitude.reshape(1, m_raw).astype(jnp.float32)
    if pad:
        # Safe pad values (pf+pb=1, amp<0.5, slop>0) keep padded lanes finite.
        pf_t = jnp.pad(pf_t, ((0, 0), (0, pad)), constant_values=0.5)
        pb_t = jnp.pad(pb_t, ((0, 0), (0, pad)), constant_values=0.5)
        slop = jnp.pad(slop, ((0, 0), (0, pad)), constant_values=1.0)
        amp = jnp.pad(amp, ((0, 0), (0, pad)), constant_values=0.25)

    tile_n = _pick_tile_n(m)
    grid = (m // tile_n,)

    kernel = functools.partial(
        _boundary_kernel,
        function_length=fl,
        distribution_length=dl,
        slope_is_zero=(function_slope == 0))

    dist_t, stats = pl.pallas_call(
        kernel,
        grid=grid,
        in_specs=[
            pl.BlockSpec((l, tile_n), lambda j: (0, j)),
            pl.BlockSpec((l, tile_n), lambda j: (0, j)),
            pl.BlockSpec((1, tile_n), lambda j: (0, j)),
            pl.BlockSpec((1, tile_n), lambda j: (0, j)),
        ],
        out_specs=[
            pl.BlockSpec((dl, tile_n), lambda j: (0, j)),
            pl.BlockSpec((2, tile_n), lambda j: (0, j)),
        ],
        out_shape=[
            jax.ShapeDtypeStruct((dl, m), jnp.float32),
            jax.ShapeDtypeStruct((2, m), jnp.float32),
        ],
        compiler_params=pltpu.CompilerParams(
            dimension_semantics=("parallel",)),
    )(pf_t, pb_t, slop, amp)

    distributions = jnp.transpose(
        dist_t[:, :m_raw].reshape(dl, b, n), (1, 2, 0))            # (B, N, D)
    distribution_mean = stats[0, :m_raw].reshape(b, n)             # (B, N)
    inv_variance = stats[1, :m_raw].reshape(b, n)                  # (B, N)
    return distributions, distribution_mean, inv_variance


# ----------------------------------------------------------------------------
# Module
# ----------------------------------------------------------------------------
class BoundaryPredictor:
    def __init__(self, function_slope, function_length, distribution_length,
                 line_distribution_extractor=None):
        self.function_slope = function_slope
        self.function_length = function_length
        self.distribution_length = distribution_length
        self.distribution_length_minus_1_half = (distribution_length - 1) / 2
        # TODO(synk): line_distribution_extractor is an injected sub-module of
        # unknown architecture; the fused Pallas path assumes it is the
        # identity on `distributions`.
        self.line_distribution_extractor = line_distribution_extractor

    def forward(self, lines_feature, lines_image_pf_segments,
                lines_image_pb_segments, lines_slop, lines_amplitude):
        if self.line_distribution_extractor is not None:
            raise NotImplementedError(
                "custom line_distribution_extractor not supported in the fused "
                "Pallas path")
        return boundary_distribution_pallas(
            lines_image_pf_segments, lines_image_pb_segments,
            lines_slop, lines_amplitude,
            function_slope=self.function_slope,
            function_length=self.function_length,
            distribution_length=self.distribution_length)


# ----------------------------------------------------------------------------
# Pure-JAX reference (mirrors the torch code) for a light correctness check
# ----------------------------------------------------------------------------
def _ref_forward(pf, pb, slop, amp, function_slope, fl, dl):
    x = jnp.arange(fl, dtype=jnp.float32) - (fl - 1) / 2.0
    amp_e = amp[..., None]
    slop_e = slop[..., None]
    if function_slope == 0:
        lf = 0.5 - amp_e * jnp.sign(x)
    else:
        lf = 0.5 - amp_e * jnp.tanh(x / (2.0 * slop_e))
    lb = 1.0 - lf
    cols = []
    for d in range(dl):
        t = pf[..., d:d + fl] * lf + pb[..., d:d + fl] * lb
        cols.append(jnp.exp(jnp.sum(jnp.log(t), axis=-1)))
    stat = jnp.stack(cols, axis=-1)                               # (B,N,D)
    denom = jnp.maximum(jnp.sum(jnp.abs(stat), axis=-1, keepdims=True), 1e-12)
    dist = stat / denom
    min_var_l = 2.0 / jnp.log((1.0 + 2.0 * amp) / (1.0 - 2.0 * amp)) ** 2
    min_var = jnp.maximum(min_var_l, slop)
    step = jnp.arange(dl, dtype=jnp.float32)
    tmp_mean = jnp.sum(step * dist, axis=-1, keepdims=True)
    tmp_var = jnp.sum((step - tmp_mean) ** 2 * dist, axis=-1)
    mean = tmp_mean[..., 0] - (dl - 1) / 2.0
    var = jnp.maximum(tmp_var, min_var)
    return dist, mean, 1.0 / var


if __name__ == "__main__":
    key = jax.random.PRNGKey(0)
    k1, k2, k3, k4 = jax.random.split(key, 4)

    B, N = 2, 16
    FUNC_LEN, DIST_LEN = 8, 8
    L = FUNC_LEN + DIST_LEN - 1          # 15
    C = 4

    pf = jax.random.uniform(k1, (B, N, L), jnp.float32, 0.05, 0.95)
    pb = 1.0 - pf
    lines_slop = jax.random.uniform(k2, (B, N), jnp.float32, 0.8, 2.0)
    lines_amplitude = jax.random.uniform(k3, (B, N), jnp.float32, 0.15, 0.4)
    lines_feature = jax.random.normal(k4, (B, C, N, L), jnp.float32)

    function_slope = 1.5                 # non-zero -> tanh branch

    predictor = BoundaryPredictor(function_slope, FUNC_LEN, DIST_LEN,
                                  line_distribution_extractor=None)
    distributions, dist_mean, inv_var = predictor.forward(
        lines_feature, pf, pb, lines_slop, lines_amplitude)
    distributions, dist_mean, inv_var = jax.block_until_ready(
        (distributions, dist_mean, inv_var))

    # reference check
    r_dist, r_mean, r_inv = _ref_forward(pf, pb, lines_slop, lines_amplitude,
                                         function_slope, FUNC_LEN, DIST_LEN)
    assert distributions.shape == (B, N, DIST_LEN)
    assert dist_mean.shape == (B, N) and inv_var.shape == (B, N)
    assert np.allclose(np.asarray(distributions), np.asarray(r_dist),
                       rtol=5e-3, atol=1e-3)
    assert np.allclose(np.asarray(dist_mean), np.asarray(r_mean),
                       rtol=5e-3, atol=2e-3)
    assert np.allclose(np.asarray(inv_var), np.asarray(r_inv),
                       rtol=5e-3, atol=2e-3)
    assert np.allclose(np.asarray(distributions).sum(-1), 1.0, atol=1e-3)
    assert not np.any(np.isnan(np.asarray(distributions)))

    print("KERNEL_OK")
</pallas_src>

<mosaic_0001>
module attributes {stable_mosaic.version = 11 : i64} {
  func.func @_boundary_kernel(%arg0: i32, %arg1: memref<15x128xf32, #tpu.memory_space<vmem>>, %arg2: memref<15x128xf32, #tpu.memory_space<vmem>>, %arg3: memref<1x128xf32, #tpu.memory_space<vmem>>, %arg4: memref<1x128xf32, #tpu.memory_space<vmem>>, %arg5: memref<8x128xf32, #tpu.memory_space<vmem>>, %arg6: memref<2x128xf32, #tpu.memory_space<vmem>>) attributes {dimension_semantics = [#tpu.dimension_semantics<parallel>], iteration_bounds = array<i64: 1>, scalar_prefetch = 0 : i64, scratch_operands = 0 : i64, tpu.core_type = #tpu.core_type<tc>, window_params = [{transform_indices = @transform_0, window_bounds = array<i64: 15, 128>}, {transform_indices = @transform_1, window_bounds = array<i64: 15, 128>}, {transform_indices = @transform_2, window_bounds = array<i64: 1, 128>}, {transform_indices = @transform_3, window_bounds = array<i64: 1, 128>}, {transform_indices = @transform_4, window_bounds = array<i64: 8, 128>}, {transform_indices = @transform_5, window_bounds = array<i64: 2, 128>}]} {
    %c0 = arith.constant 0 : index
    %c0_0 = arith.constant 0 : index
    %0 = vector.load %arg1[%c0, %c0_0] : memref<15x128xf32, #tpu.memory_space<vmem>>, vector<15x128xf32>
    %c0_1 = arith.constant 0 : index
    %c0_2 = arith.constant 0 : index
    %1 = vector.load %arg2[%c0_1, %c0_2] : memref<15x128xf32, #tpu.memory_space<vmem>>, vector<15x128xf32>
    %c0_3 = arith.constant 0 : index
    %c0_4 = arith.constant 0 : index
    %2 = vector.load %arg3[%c0_3, %c0_4] : memref<1x128xf32, #tpu.memory_space<vmem>>, vector<1x128xf32>
    %c0_5 = arith.constant 0 : index
    %c0_6 = arith.constant 0 : index
    %3 = vector.load %arg4[%c0_5, %c0_6] : memref<1x128xf32, #tpu.memory_space<vmem>>, vector<1x128xf32>
    %cst = arith.constant 2.000000e+00 : f32
    %4 = vector.broadcast %cst : f32 to vector<1x128xf32>
    %5 = arith.mulf %4, %2 : vector<1x128xf32>
    %cst_7 = arith.constant 1.000000e+00 : f32
    %6 = vector.broadcast %cst_7 : f32 to vector<1x128xf32>
    %7 = arith.divf %6, %5 : vector<1x128xf32>
    %cst_8 = arith.constant -3.500000e+00 : f32
    %8 = vector.broadcast %cst_8 : f32 to vector<1x128xf32>
    %9 = arith.mulf %8, %7 : vector<1x128xf32>
    %10 = math.tanh %9 : vector<1x128xf32>
    %11 = arith.mulf %3, %10 : vector<1x128xf32>
    %cst_9 = arith.constant 5.000000e-01 : f32
    %12 = vector.broadcast %cst_9 : f32 to vector<1x128xf32>
    %13 = arith.subf %12, %11 : vector<1x128xf32>
    %14 = arith.mulf %3, %10 : vector<1x128xf32>
    %cst_10 = arith.constant 5.000000e-01 : f32
    %15 = vector.broadcast %cst_10 : f32 to vector<1x128xf32>
    %16 = arith.addf %15, %14 : vector<1x128xf32>
    %cst_11 = arith.constant -2.500000e+00 : f32
    %17 = vector.broadcast %cst_11 : f32 to vector<1x128xf32>
    %18 = arith.mulf %17, %7 : vector<1x128xf32>
    %19 = math.tanh %18 : vector<1x128xf32>
    %20 = arith.mulf %3, %19 : vector<1x128xf32>
    %cst_12 = arith.constant 5.000000e-01 : f32
    %21 = vector.broadcast %cst_12 : f32 to vector<1x128xf32>
    %22 = arith.subf %21, %20 : vector<1x128xf32>
    %23 = arith.mulf %3, %19 : vector<1x128xf32>
    %cst_13 = arith.constant 5.000000e-01 : f32
    %24 = vector.broadcast %cst_13 : f32 to vector<1x128xf32>
    %25 = arith.addf %24, %23 : vector<1x128xf32>
    %cst_14 = arith.constant -1.500000e+00 : f32
    %26 = vector.broadcast %cst_14 : f32 to vector<1x128xf32>
    %27 = arith.mulf %26, %7 : vector<1x128xf32>
    %28 = math.tanh %27 : vector<1x128xf32>
    %29 = arith.mulf %3, %28 : vector<1x128xf32>
    %cst_15 = arith.constant 5.000000e-01 : f32
    %30 = vector.broadcast %cst_15 : f32 to vector<1x128xf32>
    %31 = arith.subf %30, %29 : vector<1x128xf32>
    %32 = arith.mulf %3, %28 : vector<1x128xf32>
    %cst_16 = arith.constant 5.000000e-01 : f32
    %33 = vector.broadcast %cst_16 : f32 to vector<1x128xf32>
    %34 = arith.addf %33, %32 : vector<1x128xf32>
    %cst_17 = arith.constant -5.000000e-01 : f32
    %35 = vector.broadcast %cst_17 : f32 to vector<1x128xf32>
    %36 = arith.mulf %35, %7 : vector<1x128xf32>
    %37 = math.tanh %36 : vector<1x128xf32>
    %38 = arith.mulf %3, %37 : vector<1x128xf32>
    %cst_18 = arith.constant 5.000000e-01 : f32
    %39 = vector.broadcast %cst_18 : f32 to vector<1x128xf32>
    %40 = arith.subf %39, %38 : vector<1x128xf32>
    %41 = arith.mulf %3, %37 : vector<1x128xf32>
    %cst_19 = arith.constant 5.000000e-01 : f32
    %42 = vector.broadcast %cst_19 : f32 to vector<1x128xf32>
    %43 = arith.addf %42, %41 : vector<1x128xf32>
    %44 = arith.subf %0, %1 : vector<15x128xf32>
    %45 = vector.extract_strided_slice %1 {offsets = [0, 0], sizes = [8, 128], strides = [1, 1]} : vector<15x128xf32> to vector<8x128xf32>
    %46 = vector.extract_strided_slice %44 {offsets = [0, 0], sizes = [8, 128], strides = [1, 1]} : vector<15x128xf32> to vector<8x128xf32>
    %47 = vector.broadcast %13 : vector<1x128xf32> to vector<8x128xf32>
    %48 = arith.mulf %47, %46 : vector<8x128xf32>
    %49 = arith.addf %45, %48 : vector<8x128xf32>
    %50 = vector.extract_strided_slice %1 {offsets = [1, 0], sizes = [8, 128], strides = [1, 1]} : vector<15x128xf32> to vector<8x128xf32>
    %51 = vector.extract_strided_slice %44 {offsets = [1, 0], sizes = [8, 128], strides = [1, 1]} : vector<15x128xf32> to vector<8x128xf32>
    %52 = vector.broadcast %22 : vector<1x128xf32> to vector<8x128xf32>
    %53 = arith.mulf %52, %51 : vector<8x128xf32>
    %54 = arith.addf %50, %53 : vector<8x128xf32>
    %55 = arith.mulf %49, %54 : vector<8x128xf32>
    %56 = vector.extract_strided_slice %1 {offsets = [2, 0], sizes = [8, 128], strides = [1, 1]} : vector<15x128xf32> to vector<8x128xf32>
    %57 = vector.extract_strided_slice %44 {offsets = [2, 0], sizes = [8, 128], strides = [1, 1]} : vector<15x128xf32> to vector<8x128xf32>
    %58 = vector.broadcast %31 : vector<1x128xf32> to vector<8x128xf32>
    %59 = arith.mulf %58, %57 : vector<8x128xf32>
    %60 = arith.addf %56, %59 : vector<8x128xf32>
    %61 = arith.mulf %55, %60 : vector<8x128xf32>
    %62 = vector.extract_strided_slice %1 {offsets = [3, 0], sizes = [8, 128], strides = [1, 1]} : vector<15x128xf32> to vector<8x128xf32>
    %63 = vector.extract_strided_slice %44 {offsets = [3, 0], sizes = [8, 128], strides = [1, 1]} : vector<15x128xf32> to vector<8x128xf32>
    %64 = vector.broadcast %40 : vector<1x128xf32> to vector<8x128xf32>
    %65 = arith.mulf %64, %63 : vector<8x128xf32>
    %66 = arith.addf %62, %65 : vector<8x128xf32>
    %67 = arith.mulf %61, %66 : vector<8x128xf32>
    %68 = vector.extract_strided_slice %1 {offsets = [4, 0], sizes = [8, 128], strides = [1, 1]} : vector<15x128xf32> to vector<8x128xf32>
    %69 = vector.extract_strided_slice %44 {offsets = [4, 0], sizes = [8, 128], strides = [1, 1]} : vector<15x128xf32> to vector<8x128xf32>
    %70 = vector.broadcast %43 : vector<1x128xf32> to vector<8x128xf32>
    %71 = arith.mulf %70, %69 : vector<8x128xf32>
    %72 = arith.addf %68, %71 : vector<8x128xf32>
    %73 = arith.mulf %67, %72 : vector<8x128xf32>
    %74 = vector.extract_strided_slice %1 {offsets = [5, 0], sizes = [8, 128], strides = [1, 1]} : vector<15x128xf32> to vector<8x128xf32>
    %75 = vector.extract_strided_slice %44 {offsets = [5, 0], sizes = [8, 128], strides = [1, 1]} : vector<15x128xf32> to vector<8x128xf32>
    %76 = vector.broadcast %34 : vector<1x128xf32> to vector<8x128xf32>
    %77 = arith.mulf %76, %75 : vector<8x128xf32>
    %78 = arith.addf %74, %77 : vector<8x128xf32>
    %79 = arith.mulf %73, %78 : vector<8x128xf32>
    %80 = vector.extract_strided_slice %1 {offsets = [6, 0], sizes = [8, 128], strides = [1, 1]} : vector<15x128xf32> to vector<8x128xf32>
    %81 = vector.extract_strided_slice %44 {offsets = [6, 0], sizes = [8, 128], strides = [1, 1]} : vector<15x128xf32> to vector<8x128xf32>
    %82 = vector.broadcast %25 : vector<1x128xf32> to vector<8x128xf32>
    %83 = arith.mulf %82, %81 : vector<8x128xf32>
    %84 = arith.addf %80, %83 : vector<8x128xf32>
    %85 = arith.mulf %79, %84 : vector<8x128xf32>
    %86 = vector.extract_strided_slice %1 {offsets = [7, 0], sizes = [8, 128], strides = [1, 1]} : vector<15x128xf32> to vector<8x128xf32>
    %87 = vector.extract_strided_slice %44 {offsets = [7, 0], sizes = [8, 128], strides = [1, 1]} : vector<15x128xf32> to vector<8x128xf32>
    %88 = vector.broadcast %16 : vector<1x128xf32> to vector<8x128xf32>
    %89 = arith.mulf %88, %87 : vector<8x128xf32>
    %90 = arith.addf %86, %89 : vector<8x128xf32>
    %91 = arith.mulf %85, %90 : vector<8x128xf32>
    %cst_20 = arith.constant dense<0.000000e+00> : vector<128xf32>
    %92 = vector.multi_reduction <add>, %91, %cst_20 [0] : vector<8x128xf32> to vector<128xf32>
    %93 = vector.shape_cast %92 : vector<128xf32> to vector<1x128xf32>
    %cst_21 = arith.constant 9.99999996E-13 : f32
    %94 = vector.broadcast %cst_21 : f32 to vector<1x128xf32>
    %95 = arith.maximumf %93, %94 : vector<1x128xf32>
    %cst_22 = arith.constant 1.000000e+00 : f32
    %96 = vector.broadcast %cst_22 : f32 to vector<1x128xf32>
    %97 = arith.divf %96, %95 : vector<1x128xf32>
    %98 = vector.broadcast %97 : vector<1x128xf32> to vector<8x128xf32>
    %99 = arith.mulf %91, %98 : vector<8x128xf32>
    %c0_23 = arith.constant 0 : index
    %c0_24 = arith.constant 0 : index
    %100 = vector.load %arg5[%c0_23, %c0_24] : memref<8x128xf32, #tpu.memory_space<vmem>>, vector<8x128xf32>
    tpu.vector_store %arg5[%c0_23, %c0_24], %99 {strides = array<i32>} : memref<8x128xf32, #tpu.memory_space<vmem>>, vector<8x128xf32>,
    %101 = tpu.iota {dimensions = array<i32: 0>} : vector<8x1xi32>
    %102 = arith.sitofp %101 : vector<8x1xi32> to vector<8x1xf32>
    %103 = vector.broadcast %102 : vector<8x1xf32> to vector<8x128xf32>
    %104 = arith.mulf %103, %99 : vector<8x128xf32>
    %cst_25 = arith.constant dense<0.000000e+00> : vector<128xf32>
    %105 = vector.multi_reduction <add>, %104, %cst_25 [0] : vector<8x128xf32> to vector<128xf32>
    %106 = vector.shape_cast %105 : vector<128xf32> to vector<1x128xf32>
    %107 = vector.broadcast %102 : vector<8x1xf32> to vector<8x128xf32>
    %108 = vector.broadcast %106 : vector<1x128xf32> to vector<8x128xf32>
    %109 = arith.subf %107, %108 : vector<8x128xf32>
    %110 = arith.mulf %109, %109 : vector<8x128xf32>
    %111 = arith.mulf %110, %99 : vector<8x128xf32>
    %cst_26 = arith.constant dense<0.000000e+00> : vector<128xf32>
    %112 = vector.multi_reduction <add>, %111, %cst_26 [0] : vector<8x128xf32> to vector<128xf32>
    %113 = vector.shape_cast %112 : vector<128xf32> to vector<1x128xf32>
    %cst_27 = arith.constant 3.500000e+00 : f32
    %114 = vector.broadcast %cst_27 : f32 to vector<1x128xf32>
    %115 = arith.subf %106, %114 : vector<1x128xf32>
    %cst_28 = arith.constant 2.000000e+00 : f32
    %116 = vector.broadcast %cst_28 : f32 to vector<1x128xf32>
    %117 = arith.mulf %116, %3 : vector<1x128xf32>
    %cst_29 = arith.constant 1.000000e+00 : f32
    %118 = vector.broadcast %cst_29 : f32 to vector<1x128xf32>
    %119 = arith.addf %118, %117 : vector<1x128xf32>
    %cst_30 = arith.constant 2.000000e+00 : f32
    %120 = vector.broadcast %cst_30 : f32 to vector<1x128xf32>
    %121 = arith.mulf %120, %3 : vector<1x128xf32>
    %cst_31 = arith.constant 1.000000e+00 : f32
    %122 = vector.broadcast %cst_31 : f32 to vector<1x128xf32>
    %123 = arith.subf %122, %121 : vector<1x128xf32>
    %124 = arith.divf %119, %123 : vector<1x128xf32>
    %125 = math.log %124 : vector<1x128xf32>
    %126 = arith.mulf %125, %125 : vector<1x128xf32>
    %cst_32 = arith.constant 2.000000e+00 : f32
    %127 = vector.broadcast %cst_32 : f32 to vector<1x128xf32>
    %128 = arith.divf %127, %126 : vector<1x128xf32>
    %129 = arith.maximumf %128, %2 : vector<1x128xf32>
    %130 = arith.maximumf %113, %129 : vector<1x128xf32>
    %cst_33 = arith.constant 1.000000e+00 : f32
    %131 = vector.broadcast %cst_33 : f32 to vector<1x128xf32>
    %132 = arith.divf %131, %130 : vector<1x128xf32>
    %c0_34 = arith.constant 0 : index
    %c0_35 = arith.constant 0 : index
    %133 = vector.load %arg6[%c0_34, %c0_35] : memref<2x128xf32, #tpu.memory_space<vmem>>, vector<1x128xf32>
    tpu.vector_store %arg6[%c0_34, %c0_35], %115 {strides = array<i32>} : memref<2x128xf32, #tpu.memory_space<vmem>>, vector<1x128xf32>,
    %c1 = arith.constant 1 : index
    %c0_36 = arith.constant 0 : index
    %134 = vector.load %arg6[%c1, %c0_36] : memref<2x128xf32, #tpu.memory_space<vmem>>, vector<1x128xf32>
    tpu.vector_store %arg6[%c1, %c0_36], %132 {strides = array<i32>} : memref<2x128xf32, #tpu.memory_space<vmem>>, vector<1x128xf32>,
    return
  }
  func.func @transform_0(%arg0: i32) -> (i32, i32) {
    %c0_i32 = arith.constant 0 : i32
    %c0_i32_0 = arith.constant 0 : i32
    return %c0_i32, %arg0 : i32, i32
  }
  func.func @transform_1(%arg0: i32) -> (i32, i32) {
    %c0_i32 = arith.constant 0 : i32
    %c0_i32_0 = arith.constant 0 : i32
    return %c0_i32, %arg0 : i32, i32
  }
  func.func @transform_2(%arg0: i32) -> (i32, i32) {
    %c0_i32 = arith.constant 0 : i32
    %c0_i32_0 = arith.constant 0 : i32
    return %c0_i32, %arg0 : i32, i32
  }
  func.func @transform_3(%arg0: i32) -> (i32, i32) {
    %c0_i32 = arith.constant 0 : i32
    %c0_i32_0 = arith.constant 0 : i32
    return %c0_i32, %arg0 : i32, i32
  }
  func.func @transform_4(%arg0: i32) -> (i32, i32) {
    %c0_i32 = arith.constant 0 : i32
    %c0_i32_0 = arith.constant 0 : i32
    return %c0_i32, %arg0 : i32, i32
  }
  func.func @transform_5(%arg0: i32) -> (i32, i32) {
    %c0_i32 = arith.constant 0 : i32
    %c0_i32_0 = arith.constant 0 : i32
    return %c0_i32, %arg0 : i32, i32
  }
}

</mosaic_0001>

<bundles_post_ra>
// kernel: tpu_custom_call.1
= control target key start
LH: loop header
LB: loop body
LE: loop exit
PB: predicated region body
PF: predicated region fallthrough
CT: control target
= control target key end

     0   :  { %11 = vsyncpa [#allocation3], 0  ;;  %s575_s0 = inlined_call_operand.hbm [shape: f32[15,128], index: 0, kind: input, shape index: {}]   ;;  %s576_s1 = inlined_call_operand.hbm [shape: f32[15,128], index: 1, kind: input, shape index: {}]   ;;  %s577_s2 = inlined_call_operand.vmem [shape: f32[1,128], index: 2, kind: input, shape index: {}]   ;;  %s578_s3 = inlined_call_operand.vmem [shape: f32[1,128], index: 3, kind: input, shape index: {}]   ;;  %s579_s4 = inlined_call_operand.hbm [shape: f32[8,128], index: 4, kind: output, shape index: {0}]   ;;  %s580_s5 = inlined_call_operand.hbm [shape: f32[2,128], index: 5, kind: output, shape index: {1}]  }
   0x1   :  { %12 = vsyncpa [#allocation6], 0 }
   0x2   :  { %13 = vsyncpa [#allocation4], 0 }
   0x3   :  { %14 = vsyncpa [#allocation9], 0  ;;  %s19_s20 = sshll.u32 %s575_s0, 4  ;;  %s471_s21 = smov [#allocation2]   ;;  %s20_s20 = int_to_ptr.hbm [resolvable:$true] %s19_s20 }
   0x4   :  { %s21_s22 = sshll.u32 %s471_s21, 4  ;;  %s32_s25 = sshll.u32 %s576_s1, 4  ;;  %s22_s22 = int_to_ptr.vmem [resolvable:$true] %s21_s22  ;;  %s33_s25 = int_to_ptr.hbm [resolvable:$true] %s32_s25 }
   0x5   :  { %s472_s26 = smov 128   ;;  %s473_s27 = smov 8  }
   0x6   :  { %27 = dma.hbm_to_vmem [thread:$0]  %s20_s20, 256, %s22_s22, [#allocation3], %s472_s26, %s472_s26, %s473_s27  }
   0x7   :  { %s474_s28 = smov [#allocation5]  }
   0x8   :  { %s34_s29 = sshll.u32 %s474_s28, 4  ;;  %s35_s29 = int_to_ptr.vmem [resolvable:$true] %s34_s29 }
   0x9   :  { %40 = dma.hbm_to_vmem [thread:$0]  %s33_s25, 256, %s35_s29, [#allocation6], %s472_s26, %s472_s26, %s473_s27  }
   0xa   :  { %463 = dma.done.wait [#allocation3], 256  }
   0xb   :  { %464 = vsyncadd [#allocation3], 4294967040 }
   0xc   :  { %465 = dma.done.wait [#allocation6], 256  }
   0xd   :  { %466 = vsyncadd [#allocation6], 4294967040  ;;  %v516_v0 = vld [vmem:[%s577_s2] sm:$0x1]  ;;  %v54_v17 = vld [vmem:[#allocation2 + $0x8] sm:$0x7f] }
   0xe   :  { %v59_v1 = vmul.f32 2.0, %v516_v0  ;;  %v53_v16 = vld [vmem:[#allocation2] sm:$0xff]  ;;  %v519_v18 = vld [vmem:[#allocation5] sm:$0xff]  ;;  %v521_v19 = vld [vmem:[#allocation5 + $0x8] sm:$0x7f]  ;;  %vm111_vm4 = vcmask 1046528  }
   0xf   :  { %v526_v20 = vld [vmem:[%s578_s3] sm:$0x1]  ;;  %v95_v26 = vsub.f32 %v53_v16, %v519_v18  ;;  %v532_v27 = vsub.f32 %v54_v17, %v521_v19  ;;  %vm126_vm5 = vcmask 1045504   ;;  %vm141_vm6 = vcmask 1044480   ;;  %s475_s3 = smov [#allocation7]   ;;  %s313_s9 = sshll.u32 %s579_s4, 4  ;;  %s314_s9 = int_to_ptr.hbm [resolvable:$true] %s313_s9 }
  0x10   :  { %347 = vrcp.f32 %v59_v1  ;;  %v71_v4 = vand.u32 2147483648, %v59_v1  ;;  %vm65_vm0 = vweird.f32 %v59_v1  ;;  %v69_v6 = vand.u32 2147483647, %v59_v1  ;;  %s311_s6 = sshll.u32 %s475_s3, 4  ;;  %s476_s4 = smov [#allocation8]   ;;  %s312_s6 = int_to_ptr.vmem [resolvable:$true] %s311_s6 }
  0x11   :  { %vm156_vm7 = vcmask 1043456   ;;  %vm171_vm8 = vcmask 1042432   ;;  %vm186_vm9 = vcmask 1041408   ;;  %vm201_vm10 = vcmask 1040384   ;;  %s322_s10 = sshll.u32 %s476_s4, 4  ;;  %s324_s13 = sshll.u32 %s580_s5, 4  ;;  %s323_s10 = int_to_ptr.vmem [resolvable:$true] %s322_s10  ;;  %s325_s13 = int_to_ptr.hbm [resolvable:$true] %s324_s13 }
  0x12   :  { %v72_v8 = vor.u32 1.1754944e-38, %v71_v4  ;;  %vm70_vm3 = vcmp.eq.f32.partialorder %v69_v6, 8.507059e+37 }
  0x16   :  { %v348_v2 = vpop.eup %347 }
  0x17   :  { %v61_v3 = vmul.f32 %v348_v2, %v59_v1  ;;  %vm66_vm1 = vweird.f32 %v348_v2 }
  0x18   :  { %vm67_vm2 = vmor %vm65_vm0, %vm66_vm1 }
  0x19   :  { %v62_v5 = vsub.f32 1.0, %v61_v3 }
  0x1b   :  { %v63_v7 = vmul.f32 %v348_v2, %v62_v5 }
  0x1d   :  { %v64_v9 = vadd.f32 %v348_v2, %v63_v7 }
  0x1f   :  { %v68_v10 = vsel %vm67_vm2, %v348_v2, %v64_v9 }
  0x20   :  { %v73_v11 = vsel %vm70_vm3, %v72_v8, %v68_v10 }
  0x21   :  { %v75_v12 = vmul.f32 -3.5, %v73_v11  ;;  %v80_v13 = vmul.f32 -2.5, %v73_v11  ;;  %v85_v14 = vmul.f32 -1.5, %v73_v11  ;;  %v90_v15 = vmul.f32 -0.5, %v73_v11 }
  0x23   :  { %349 = vtanh.f32 %v75_v12 }
  0x24   :  { %351 = vtanh.f32 %v80_v13 }
  0x25   :  { %353 = vtanh.f32 %v85_v14 }
  0x26   :  { %355 = vtanh.f32 %v90_v15 }
  0x29   :  { %v350_v21 = vpop.eup %349 }
  0x2a   :  { %v352_v22 = vpop.eup %351  ;;  %v77_v23 = vmul.f32 %v350_v21, %v526_v20 }
  0x2b   :  { %v354_v24 = vpop.eup %353  ;;  %v82_v25 = vmul.f32 %v352_v22, %v526_v20 }
  0x2c   :  { %v356_v28 = vpop.eup %355  ;;  %v78_v29 = vsub.f32 0.5, %v77_v23  ;;  %v534_v30 = vadd.f32 0.5, %v77_v23  ;;  %v87_v31 = vmul.f32 %v354_v24, %v526_v20 }
  0x2d   :  { %v83_v32 = vsub.f32 0.5, %v82_v25  ;;  %v84_v33 = vadd.f32 0.5, %v82_v25  ;;  %v92_v34 = vmul.f32 %v356_v28, %v526_v20 }
  0x2e   :  { %v88_v35 = vsub.f32 0.5, %v87_v31  ;;  %v89_v36 = vadd.f32 0.5, %v87_v31  ;;  %v98_v37 = vperm.slane %v78_v29, 0  ;;  %v193_v38 = vperm.slane %v534_v30, 0 }
  0x2f   :  { %v93_v39 = vsub.f32 0.5, %v92_v34  ;;  %v94_v40 = vadd.f32 0.5, %v92_v34  ;;  %v103_v41 = vperm.slane %v83_v32, 0  ;;  %v178_v42 = vperm.slane %v84_v33, 0 }
  0x30   :  { %v100_v43 = vmul.f32 %v98_v37, %v95_v26  ;;  %v118_v44 = vperm.slane %v88_v35, 0  ;;  %v163_v45 = vperm.slane %v89_v36, 0  ;;  %v195_v46 = vmul.f32 %v193_v38, %v95_v26 }
  0x31   :  { %v105_v47 = vmul.f32 %v103_v41, %v95_v26  ;;  %v106_v48 = vmul.f32 %v103_v41, %v532_v27  ;;  %v133_v49 = vperm.slane %v93_v39, 0  ;;  %v148_v50 = vperm.slane %v94_v40, 0 }
  0x32   :  { %v101_v51 = vadd.f32 %v100_v43, %v519_v18  ;;  %v120_v52 = vmul.f32 %v118_v44, %v95_v26  ;;  %v121_v53 = vmul.f32 %v118_v44, %v532_v27  ;;  %v165_v54 = vmul.f32 %v163_v45, %v95_v26 }
  0x33   :  { %v107_v55 = vadd.f32 %v105_v47, %v519_v18  ;;  %v108_v56 = vadd.f32 %v106_v48, %v521_v19  ;;  %v135_v57 = vmul.f32 %v133_v49, %v95_v26  ;;  %v136_v58 = vmul.f32 %v133_v49, %v532_v27 }
  0x34   :  { %v122_v59 = vadd.f32 %v120_v52, %v519_v18  ;;  %v123_v60 = vadd.f32 %v121_v53, %v521_v19  ;;  %v150_v61 = vmul.f32 %v148_v50, %v95_v26  ;;  %v151_v62 = vmul.f32 %v148_v50, %v532_v27 }
  0x35   :  { %v112_v63 = vrot.slane %v107_v55, 1  ;;  %v113_v1 = vrot.slane %v108_v56, 1  ;;  %v137_v2 = vadd.f32 %v135_v57, %v519_v18  ;;  %v138_v3 = vadd.f32 %v136_v58, %v521_v19 }
  0x36   :  { %v127_v4 = vrot.slane %v122_v59, 2  ;;  %v128_v5 = vrot.slane %v123_v60, 2  ;;  %v152_v6 = vadd.f32 %v150_v61, %v519_v18  ;;  %v153_v7 = vadd.f32 %v151_v62, %v521_v19 }
  0x37   :  { %v114_v8 = vsel %vm111_vm4, %v112_v63, %v113_v1  ;;  %v142_v9 = vrot.slane %v137_v2, 3  ;;  %v143_v10 = vrot.slane %v138_v3, 3  ;;  %v166_v11 = vmul.f32 %v163_v45, %v532_v27 }
  0x38   :  { %v116_v12 = vmul.f32 %v114_v8, %v101_v51  ;;  %v129_v13 = vsel %vm126_vm5, %v127_v4, %v128_v5  ;;  %v157_v14 = vrot.slane %v152_v6, 4  ;;  %v158_v15 = vrot.slane %v153_v7, 4 }
  0x39   :  { %v144_v16 = vsel %vm141_vm6, %v142_v9, %v143_v10  ;;  %v167_v17 = vadd.f32 %v165_v54, %v519_v18  ;;  %v168_v21 = vadd.f32 %v166_v11, %v521_v19  ;;  %v180_v22 = vmul.f32 %v178_v42, %v95_v26 }
  0x3a   :  { %v131_v23 = vmul.f32 %v129_v13, %v116_v12  ;;  %v159_v24 = vsel %vm156_vm7, %v157_v14, %v158_v15  ;;  %v181_v25 = vmul.f32 %v178_v42, %v532_v27  ;;  %v196_v28 = vmul.f32 %v193_v38, %v532_v27 }
  0x3b   :  { %v172_v29 = vrot.slane %v167_v17, 5  ;;  %v173_v30 = vrot.slane %v168_v21, 5  ;;  %v182_v31 = vadd.f32 %v180_v22, %v519_v18  ;;  %v197_v32 = vadd.f32 %v195_v46, %v519_v18 }
  0x3c   :  { %v146_v33 = vmul.f32 %v144_v16, %v131_v23  ;;  %v183_v34 = vadd.f32 %v181_v25, %v521_v19  ;;  %v198_v35 = vadd.f32 %v196_v28, %v521_v19  ;;  %v251_v26 = vmul.f32 2.0, %v526_v20 }
  0x3d   :  { %v174_v36 = vsel %vm171_vm8, %v172_v29, %v173_v30  ;;  %v187_v37 = vrot.slane %v182_v31, 6  ;;  %v202_v39 = vrot.slane %v197_v32, 7  ;;  %v231_v4 = vlaneseq }
  0x3e   :  { %v161_v40 = vmul.f32 %v159_v24, %v146_v33  ;;  %v188_v27 = vrot.slane %v183_v34, 6  ;;  %v203_v38 = vrot.slane %v198_v35, 7  ;;  %v253_v41 = vsub.f32 1.0, %v251_v26 }
  0x3f   :  { %v252_v55 = vadd.f32 1.0, %v251_v26  ;;  %v232_v10 = vshrl.u32 %v231_v4, 7 }
  0x40   :  { %v176_v42 = vmul.f32 %v174_v36, %v161_v40  ;;  %v189_v43 = vsel %vm186_vm9, %v187_v37, %v188_v27  ;;  %357 = vrcp.f32 %v253_v41  ;;  %v204_v18 = vsel %vm201_vm10, %v202_v39, %v203_v38 }
  0x41   :  { %v265_v48 = vand.u32 2147483648, %v253_v41  ;;  %vm259_vm11 = vweird.f32 %v253_v41  ;;  %v263_v50 = vand.u32 2147483647, %v253_v41  ;;  %v233_v14 = vcvt.s32.f32 %v232_v10 }
  0x42   :  { %v191_v44 = vmul.f32 %v189_v43, %v176_v42 }
  0x43   :  { %v266_v54 = vor.u32 1.1754944e-38, %v265_v48  ;;  %vm264_vm14 = vcmp.eq.f32.partialorder %v263_v50, 8.507059e+37 }
  0x44   :  { %v206_v45 = vmul.f32 %v204_v18, %v191_v44 }
  0x46   :  { %v358_v46 = vpop.eup %357  ;;  %v207_v19 = vrot.slane %v206_v45, 4 }
  0x47   :  { %v255_v47 = vmul.f32 %v358_v46, %v253_v41  ;;  %vm260_vm12 = vweird.f32 %v358_v46 }
  0x48   :  { %v208_v20 = vadd.f32 %v207_v19, %v206_v45  ;;  %vm261_vm13 = vmor %vm259_vm11, %vm260_vm12 }
  0x49   :  { %v256_v49 = vsub.f32 1.0, %v255_v47 }
  0x4a   :  { %v209_v51 = vrot.slane %v208_v20, 2 }
  0x4b   :  { %v257_v52 = vmul.f32 %v358_v46, %v256_v49 }
  0x4c   :  { %v210_v53 = vadd.f32 %v209_v51, %v208_v20 }
  0x4d   :  { %v258_v56 = vadd.f32 %v358_v46, %v257_v52 }
  0x4e   :  { %v211_v57 = vrot.slane %v210_v53, 1 }
  0x4f   :  { %v262_v58 = vsel %vm261_vm13, %v358_v46, %v258_v56 }
  0x50   :  { %v212_v59 = vadd.f32 %v211_v57, %v210_v53  ;;  %v267_v60 = vsel %vm264_vm14, %v266_v54, %v262_v58 }
  0x51   :  { %v268_v61 = vmul.f32 %v267_v60, %v252_v55 }
  0x52   :  { %v213_v62 = vmax.f32 %v212_v59, 1e-12 }
  0x53   :  { %359 = vlog2.f32 %v268_v61 }
  0x54   :  { %361 = vrcp.f32 %v213_v62  ;;  %v225_v5 = vand.u32 2147483648, %v213_v62  ;;  %vm219_vm15 = vweird.f32 %v213_v62  ;;  %v223_v8 = vand.u32 2147483647, %v213_v62 }
  0x56   :  { %v226_v11 = vor.u32 1.1754944e-38, %v225_v5  ;;  %vm224_vm2 = vcmp.eq.f32.partialorder %v223_v8, 8.507059e+37 }
  0x59   :  { %v360_v63 = vpop.eup %359 }
  0x5a   :  { %v362_v1 = vpop.eup %361  ;;  %v270_v2 = vmul.f32 0.6931472, %v360_v63 }
  0x5b   :  { %v215_v3 = vmul.f32 %v362_v1, %v213_v62  ;;  %vm220_vm0 = vweird.f32 %v362_v1 }
  0x5c   :  { %v271_v6 = vmul.f32 %v270_v2, %v270_v2  ;;  %vm221_vm1 = vmor %vm219_vm15, %vm220_vm0 }
  0x5d   :  { %v216_v7 = vsub.f32 1.0, %v215_v3 }
  0x5e   :  { %363 = vrcp.f32 %v271_v6  ;;  %vm277_vm3 = vweird.f32 %v271_v6  ;;  %v283_v33 = vand.u32 2147483648, %v271_v6  ;;  %v281_v36 = vand.u32 2147483647, %v271_v6 }
  0x5f   :  { %v217_v9 = vmul.f32 %v362_v1, %v216_v7 }
  0x60   :  { %v284_v39 = vor.u32 1.1754944e-38, %v283_v33  ;;  %vm282_vm6 = vcmp.eq.f32.partialorder %v281_v36, 8.507059e+37 }
  0x61   :  { %v218_v12 = vadd.f32 %v362_v1, %v217_v9 }
  0x63   :  { %v222_v13 = vsel %vm221_vm1, %v362_v1, %v218_v12 }
  0x64   :  { %v227_v15 = vsel %vm224_vm2, %v226_v11, %v222_v13  ;;  %v364_v17 = vpop.eup %363 }
  0x65   :  { %v229_v16 = vmul.f32 %v227_v15, %v206_v45  ;;  %v273_v23 = vmul.f32 %v364_v17, %v271_v6  ;;  %vm278_vm4 = vweird.f32 %v364_v17 }
  0x66   :  { %vm279_vm5 = vmor %vm277_vm3, %vm278_vm4 }
  0x67   :  { %230 = vst [vmem:[#allocation7] sm:$0xff] %v229_v16  ;;  %v234_v21 = vmul.f32 %v233_v14, %v229_v16  ;;  %v274_v28 = vsub.f32 1.0, %v273_v23 }
  0x68   :  { %316 = dma.vmem_to_hbm [thread:$0]  %s312_s6, 128, %s314_s9, [#allocation4]  }
  0x69   :  { %v235_v22 = vrot.slane %v234_v21, 4  ;;  %v275_v31 = vmul.f32 %v364_v17, %v274_v28 }
  0x6b   :  { %v236_v24 = vadd.f32 %v235_v22, %v234_v21  ;;  %v276_v26 = vadd.f32 %v364_v17, %v275_v31 }
  0x6d   :  { %v237_v25 = vrot.slane %v236_v24, 2  ;;  %v280_v27 = vsel %vm279_vm5, %v364_v17, %v276_v26 }
  0x6e   :  { %v285_v41 = vsel %vm282_vm6, %v284_v39, %v280_v27 }
  0x6f   :  { %v238_v29 = vadd.f32 %v237_v25, %v236_v24  ;;  %v286_v18 = vmul.f32 2.0, %v285_v41 }
  0x71   :  { %v239_v30 = vrot.slane %v238_v29, 1  ;;  %v287_v46 = vmax.f32 %v286_v18, %v516_v0 }
  0x73   :  { %v240_v32 = vadd.f32 %v239_v30, %v238_v29 }
  0x75   :  { %v241_v34 = vsub.f32 %v233_v14, %v240_v32  ;;  %v340_v35 = vadd.f32 -3.5, %v240_v32 }
  0x77   :  { %v242_v37 = vmul.f32 %v241_v34, %v241_v34  ;;  %304 = vst [vmem:[#allocation8] sm:$0x1] %v340_v35 }
  0x79   :  { %v243_v40 = vmul.f32 %v242_v37, %v229_v16 }
  0x7b   :  { %v244_v38 = vrot.slane %v243_v40, 4 }
  0x7d   :  { %v245_v42 = vadd.f32 %v244_v38, %v243_v40 }
  0x7f   :  { %v246_v43 = vrot.slane %v245_v42, 2 }
  0x81   :  { %v247_v44 = vadd.f32 %v246_v43, %v245_v42 }
  0x83   :  { %v248_v45 = vrot.slane %v247_v44, 1 }
  0x85   :  { %v249_v19 = vadd.f32 %v248_v45, %v247_v44 }
  0x87   :  { %v288_v47 = vmax.f32 %v249_v19, %v287_v46 }
  0x89   :  { %365 = vrcp.f32 %v288_v47  ;;  %v300_v49 = vand.u32 2147483648, %v288_v47  ;;  %vm294_vm7 = vweird.f32 %v288_v47  ;;  %v298_v51 = vand.u32 2147483647, %v288_v47 }
  0x8b   :  { %v301_v53 = vor.u32 1.1754944e-38, %v300_v49  ;;  %vm299_vm10 = vcmp.eq.f32.partialorder %v298_v51, 8.507059e+37 }
  0x8f   :  { %v366_v20 = vpop.eup %365 }
  0x90   :  { %v290_v48 = vmul.f32 %v366_v20, %v288_v47  ;;  %vm295_vm8 = vweird.f32 %v366_v20 }
  0x91   :  { %vm296_vm9 = vmor %vm294_vm7, %vm295_vm8 }
  0x92   :  { %v291_v50 = vsub.f32 1.0, %v290_v48 }
  0x94   :  { %v292_v52 = vmul.f32 %v366_v20, %v291_v50 }
  0x96   :  { %v293_v0 = vadd.f32 %v366_v20, %v292_v52 }
  0x98   :  { %v297_v54 = vsel %vm296_vm9, %v366_v20, %v293_v0 }
  0x99   :  { %v302_v55 = vsel %vm299_vm10, %v301_v53, %v297_v54 }
  0x9a   :  { %305 = vst [vmem:[#allocation8 + $0x1] sm:$0x1] %v302_v55 }
  0x9b   :  { %327 = dma.vmem_to_hbm [thread:$0]  %s323_s10, 32, %s325_s13, [#allocation9]  }
  0x9c   :  { %467 = dma.done.wait [#allocation4], 128  }
  0x9d   :  { %468 = vsyncadd [#allocation4], 4294967168 }
  0x9e   :  { %469 = dma.done.wait [#allocation9], 32  }
  0x9f   :  { %470 = vsyncadd [#allocation9], 4294967264 }
  0xa0   :  { %336 = vsyncpa [#allocation3], 1 }
  0xa1   :  { %337 = vsyncpa [#allocation6], 1 }
  0xa2   :  { %338 = vsyncpa [#allocation4], 1 }
  0xa3   :  { %339 = vsyncpa [#allocation9], 1 }

</bundles_post_ra>
